<compile_context>
chip_gen: v5e
topology: v5e:2x2
jax: 0.10.0
libtpu: 0.0.40
codegen_flags: <defaults>
</compile_context>

<pallas_src>
import jax
import jax.numpy as jnp
from jax.experimental import pallas as pl
from jax.experimental.pallas import tpu as pltpu

N = 128  # number of nodes
K = 8    # number of communities


def _vbsbm_kernel(A_ref, ckn_ref, mu_ref, sigma_ref, eps_ref,
                  d_col_ref, d_row_ref, logq_ref, pmu_ref, psig_ref, out_ref):
    # A arrives as int8 (adjacency); cast on the VPU (cheap, lots of slack).
    A = A_ref[...].astype(jnp.float32)          # (N, N)
    c_kn = ckn_ref[...]                         # (K, N) posterior logits, N on lanes
    mu = mu_ref[...]                            # (K, K)
    sigma = sigma_ref[...]                      # (K, K)
    eps = eps_ref[...]                          # (K, K) standard-normal noise (rsample)
    d_col = d_col_ref[...]                      # (N, 1)
    d_row = d_row_ref[...]                      # (1, N)
    log_q = logq_ref[...]                       # (K, N) prior log-softmax (precomputed)
    pmu = pmu_ref[...]                          # (K, K)
    psig = psig_ref[...]                        # (K, K)

    # ---- c = softmax(self.c, dim=1) == softmax over axis 0 of the (K,N) layout
    c_max = jnp.max(c_kn, axis=0, keepdims=True)         # (1, N)
    c_shift = c_kn - c_max
    c_exp = jnp.exp(c_shift)                              # one dense (8,128) vreg
    c_sum = jnp.sum(c_exp, axis=0, keepdims=True)         # (1, N)
    c_soft = c_exp / c_sum                                # (K, N)

    # ---- theta = clamp(Normal(mu, clamp(sigma,1e-6)).rsample(), 1e-6, 1-1e-6)
    sig_c = jnp.maximum(sigma, 1e-6)
    theta = jnp.clip(mu + sig_c * eps, 1e-6, 1.0 - 1e-6)  # (K, K)

    # ---- theta_c = C @ theta @ C.T with C = (N,K) = c_soft.T, in (K,N) layout:
    #   tc[a, j]      = sum_b theta[a, b] * c_soft[b, j]
    #   theta_c[i, j] = sum_a c_soft[a, i] * tc[a, j]
    tc = jnp.dot(theta, c_soft, preferred_element_type=jnp.float32)       # (K, N)
    theta_c = jax.lax.dot_general(
        c_soft, tc,
        dimension_numbers=(((0,), (0,)), ((), ())),
        preferred_element_type=jnp.float32)                               # (N, N)

    # ---- degree correction: clamp(d @ d.T, 1e-6); Poisson-style log-likelihood
    d_outer = jnp.maximum(d_col * d_row, 1e-6)                            # (N, N)
    lam = d_outer * theta_c
    log_likelihood = jnp.sum(A * jnp.log(lam) - lam)

    # ---- KL( Cat(softmax(c)) || Cat(softmax(prior_c)) ), summed over nodes
    log_p = c_shift - jnp.log(c_sum)                                      # (K, N)
    kl_c = jnp.sum(c_soft * (log_p - log_q))

    # ---- KL( Normal(mu, sig_c) || Normal(prior_mu, prior_sigma) ), summed
    kl_mu = jnp.sum(
        jnp.log(psig / sig_c)
        + (sig_c * sig_c + (mu - pmu) ** 2) / (2.0 * psig * psig)
        - 0.5)

    elbo = log_likelihood - (kl_c + kl_mu)
    out_ref[...] = jnp.reshape(elbo, (1, 1))


def vbsbm_forward(A, c, mu, sigma, eps, d, prior_c, prior_mu, prior_sigma):
    """ELBO of the VBSBM (use_vi=True, use_degree_correction=True).

    A may be int8/bool/float; it is cast to f32 inside the kernel.
    """
    n, _ = c.shape
    # Layout plumbing (tiny 4 KiB tensors; folds away under jit):
    c_kn = jnp.transpose(c.astype(jnp.float32))                      # (K, N)
    log_q = jnp.transpose(jax.nn.log_softmax(
        prior_c.astype(jnp.float32), axis=1))                        # (K, N), constant
    d_col = d.reshape(n, 1).astype(jnp.float32)
    d_row = d.reshape(1, n).astype(jnp.float32)

    inputs = (A, c_kn, mu, sigma, eps, d_col, d_row, log_q, prior_mu, prior_sigma)
    out = pl.pallas_call(
        _vbsbm_kernel,
        out_shape=jax.ShapeDtypeStruct((1, 1), jnp.float32),
        in_specs=[pl.BlockSpec(memory_space=pltpu.MemorySpace.VMEM)
                  for _ in inputs],
        out_specs=pl.BlockSpec(memory_space=pltpu.MemorySpace.VMEM),
    )(*inputs)
    return out[0, 0]


def vbsbm_ref(A, c, mu, sigma, eps, d, prior_c, prior_mu, prior_sigma):
    """Pure-JAX reference mirroring the PyTorch forward()."""
    A = A.astype(jnp.float32)
    c_soft = jax.nn.softmax(c, axis=1)
    sig_c = jnp.maximum(sigma, 1e-6)
    theta = jnp.clip(mu + sig_c * eps, 1e-6, 1.0 - 1e-6)
    theta_c = c_soft @ theta @ c_soft.T
    d_outer = jnp.maximum(jnp.outer(d, d), 1e-6)
    ll = jnp.sum(A * jnp.log(d_outer * theta_c) - d_outer * theta_c)
    log_p = jax.nn.log_softmax(c, axis=1)
    log_q = jax.nn.log_softmax(prior_c, axis=1)
    kl_c = jnp.sum(c_soft * (log_p - log_q))
    kl_mu = jnp.sum(jnp.log(prior_sigma / sig_c)
                    + (sig_c ** 2 + (mu - prior_mu) ** 2) / (2.0 * prior_sigma ** 2)
                    - 0.5)
    return ll - (kl_c + kl_mu)


if __name__ == "__main__":
    key = jax.random.PRNGKey(0)
    k_c, k_mu, k_sig, k_A, k_eps = jax.random.split(key, 5)

    # Deterministic parameter init (shapes implied by the module __init__).
    c = 0.1 * jax.random.normal(k_c, (N, K), dtype=jnp.float32)           # logits
    mu = jax.random.uniform(k_mu, (K, K), dtype=jnp.float32,
                            minval=0.05, maxval=0.4)
    sigma = jax.random.uniform(k_sig, (K, K), dtype=jnp.float32,
                               minval=0.01, maxval=0.08)
    d = jnp.ones((N,), dtype=jnp.float32)                                 # self.d = ones(N,1)
    prior_c, prior_mu, prior_sigma = c, mu, sigma                         # priors = clones at init

    # Adjacency matrix input, stored as int8 (kernel casts to f32 in VMEM).
    A = jax.random.bernoulli(k_A, 0.1, (N, N)).astype(jnp.int8)

    # Reparameterization noise for Normal(mu, sigma).rsample()
    # (generated outside the kernel so kernel & reference share it).
    eps = jax.random.normal(k_eps, (K, K), dtype=jnp.float32)

    fwd = jax.jit(vbsbm_forward)
    elbo = fwd(A, c, mu, sigma, eps, d, prior_c, prior_mu, prior_sigma)
    elbo = jax.block_until_ready(elbo)

    ref = vbsbm_ref(A, c, mu, sigma, eps, d, prior_c, prior_mu, prior_sigma)
    if not jnp.allclose(elbo, ref, rtol=1e-4, atol=1e-3):
        raise AssertionError(f"mismatch: kernel={elbo} ref={ref}")

    print("KERNEL_OK")
</pallas_src>

<mosaic_0001>
module attributes {stable_mosaic.version = 11 : i64} {
  func.func @_vbsbm_kernel(%arg0: memref<128x128xi8, #tpu.memory_space<vmem>>, %arg1: memref<8x128xf32, #tpu.memory_space<vmem>>, %arg2: memref<8x8xf32, #tpu.memory_space<vmem>>, %arg3: memref<8x8xf32, #tpu.memory_space<vmem>>, %arg4: memref<8x8xf32, #tpu.memory_space<vmem>>, %arg5: memref<128x1xf32, #tpu.memory_space<vmem>>, %arg6: memref<1x128xf32, #tpu.memory_space<vmem>>, %arg7: memref<8x128xf32, #tpu.memory_space<vmem>>, %arg8: memref<8x8xf32, #tpu.memory_space<vmem>>, %arg9: memref<8x8xf32, #tpu.memory_space<vmem>>, %arg10: memref<1x1xf32, #tpu.memory_space<vmem>>) attributes {dimension_semantics = [], scalar_prefetch = 0 : i64, scratch_operands = 0 : i64, tpu.core_type = #tpu.core_type<tc>} {
    %c0 = arith.constant 0 : index
    %c0_0 = arith.constant 0 : index
    %0 = vector.load %arg0[%c0, %c0_0] : memref<128x128xi8, #tpu.memory_space<vmem>>, vector<128x128xi8>
    %1 = arith.sitofp %0 : vector<128x128xi8> to vector<128x128xf32>
    %c0_1 = arith.constant 0 : index
    %c0_2 = arith.constant 0 : index
    %2 = vector.load %arg1[%c0_1, %c0_2] : memref<8x128xf32, #tpu.memory_space<vmem>>, vector<8x128xf32>
    %c0_3 = arith.constant 0 : index
    %c0_4 = arith.constant 0 : index
    %3 = vector.load %arg2[%c0_3, %c0_4] : memref<8x8xf32, #tpu.memory_space<vmem>>, vector<8x8xf32>
    %c0_5 = arith.constant 0 : index
    %c0_6 = arith.constant 0 : index
    %4 = vector.load %arg3[%c0_5, %c0_6] : memref<8x8xf32, #tpu.memory_space<vmem>>, vector<8x8xf32>
    %c0_7 = arith.constant 0 : index
    %c0_8 = arith.constant 0 : index
    %5 = vector.load %arg4[%c0_7, %c0_8] : memref<8x8xf32, #tpu.memory_space<vmem>>, vector<8x8xf32>
    %c0_9 = arith.constant 0 : index
    %c0_10 = arith.constant 0 : index
    %6 = vector.load %arg5[%c0_9, %c0_10] : memref<128x1xf32, #tpu.memory_space<vmem>>, vector<128x1xf32>
    %c0_11 = arith.constant 0 : index
    %c0_12 = arith.constant 0 : index
    %7 = vector.load %arg6[%c0_11, %c0_12] : memref<1x128xf32, #tpu.memory_space<vmem>>, vector<1x128xf32>
    %c0_13 = arith.constant 0 : index
    %c0_14 = arith.constant 0 : index
    %8 = vector.load %arg7[%c0_13, %c0_14] : memref<8x128xf32, #tpu.memory_space<vmem>>, vector<8x128xf32>
    %c0_15 = arith.constant 0 : index
    %c0_16 = arith.constant 0 : index
    %9 = vector.load %arg8[%c0_15, %c0_16] : memref<8x8xf32, #tpu.memory_space<vmem>>, vector<8x8xf32>
    %c0_17 = arith.constant 0 : index
    %c0_18 = arith.constant 0 : index
    %10 = vector.load %arg9[%c0_17, %c0_18] : memref<8x8xf32, #tpu.memory_space<vmem>>, vector<8x8xf32>
    %cst = arith.constant dense<0xFF800000> : vector<128xf32>
    %11 = vector.multi_reduction <maximumf>, %2, %cst [0] : vector<8x128xf32> to vector<128xf32>
    %12 = vector.shape_cast %11 : vector<128xf32> to vector<1x128xf32>
    %13 = vector.broadcast %12 : vector<1x128xf32> to vector<8x128xf32>
    %14 = arith.subf %2, %13 : vector<8x128xf32>
    %15 = math.exp %14 : vector<8x128xf32>
    %cst_19 = arith.constant dense<0.000000e+00> : vector<128xf32>
    %16 = vector.multi_reduction <add>, %15, %cst_19 [0] : vector<8x128xf32> to vector<128xf32>
    %17 = vector.shape_cast %16 : vector<128xf32> to vector<1x128xf32>
    %18 = vector.broadcast %17 : vector<1x128xf32> to vector<8x128xf32>
    %19 = arith.divf %15, %18 : vector<8x128xf32>
    %cst_20 = arith.constant 9.99999997E-7 : f32
    %20 = vector.broadcast %cst_20 : f32 to vector<8x8xf32>
    %21 = arith.maximumf %4, %20 : vector<8x8xf32>
    %22 = arith.mulf %21, %5 : vector<8x8xf32>
    %23 = arith.addf %3, %22 : vector<8x8xf32>
    %cst_21 = arith.constant 9.99999997E-7 : f32
    %cst_22 = arith.constant 0.999998986 : f32
    %24 = vector.broadcast %cst_21 : f32 to vector<8x8xf32>
    %25 = arith.maximumf %24, %23 : vector<8x8xf32>
    %26 = vector.broadcast %cst_22 : f32 to vector<8x8xf32>
    %27 = arith.minimumf %26, %25 : vector<8x8xf32>
    %cst_23 = arith.constant dense<0.000000e+00> : vector<8x128xf32>
    %28 = tpu.matmul %27, %19, %cst_23 {dimension_numbers = #tpu.dot_dimension_numbers<[1], [0], [0], [1], [0, 0, 1, 1], [], []>} : vector<8x8xf32>, vector<8x128xf32>, vector<8x128xf32> -> vector<8x128xf32>
    %cst_24 = arith.constant dense<0.000000e+00> : vector<128x128xf32>
    %29 = tpu.matmul %19, %28, %cst_24 {dimension_numbers = #tpu.dot_dimension_numbers<[0], [0], [1], [1], [0, 1, 1, 1], [], []>} : vector<8x128xf32>, vector<8x128xf32>, vector<128x128xf32> -> vector<128x128xf32>
    %30 = vector.broadcast %6 : vector<128x1xf32> to vector<128x128xf32>
    %31 = vector.broadcast %7 : vector<1x128xf32> to vector<128x128xf32>
    %32 = arith.mulf %30, %31 : vector<128x128xf32>
    %cst_25 = arith.constant 9.99999997E-7 : f32
    %33 = vector.broadcast %cst_25 : f32 to vector<128x128xf32>
    %34 = arith.maximumf %32, %33 : vector<128x128xf32>
    %35 = arith.mulf %34, %29 : vector<128x128xf32>
    %36 = math.log %35 : vector<128x128xf32>
    %37 = arith.mulf %1, %36 : vector<128x128xf32>
    %38 = arith.subf %37, %35 : vector<128x128xf32>
    %39 = vector.shape_cast %38 : vector<128x128xf32> to vector<1x128x128xf32>
    %cst_26 = arith.constant dense<0.000000e+00> : vector<1xf32>
    %40 = vector.multi_reduction <add>, %39, %cst_26 [1, 2] : vector<1x128x128xf32> to vector<1xf32>
    %41 = vector.shape_cast %40 : vector<1xf32> to vector<1x1x1xf32>
    %42 = vector.extract %41[0, 0, 0] : f32 from vector<1x1x1xf32>
    %43 = math.log %17 : vector<1x128xf32>
    %44 = vector.broadcast %43 : vector<1x128xf32> to vector<8x128xf32>
    %45 = arith.subf %14, %44 : vector<8x128xf32>
    %46 = arith.subf %45, %8 : vector<8x128xf32>
    %47 = arith.mulf %19, %46 : vector<8x128xf32>
    %48 = vector.shape_cast %47 : vector<8x128xf32> to vector<1x8x128xf32>
    %cst_27 = arith.constant dense<0.000000e+00> : vector<1xf32>
    %49 = vector.multi_reduction <add>, %48, %cst_27 [1, 2] : vector<1x8x128xf32> to vector<1xf32>
    %50 = vector.shape_cast %49 : vector<1xf32> to vector<1x1x1xf32>
    %51 = vector.extract %50[0, 0, 0] : f32 from vector<1x1x1xf32>
    %52 = arith.divf %10, %21 : vector<8x8xf32>
    %53 = math.log %52 : vector<8x8xf32>
    %54 = arith.mulf %21, %21 : vector<8x8xf32>
    %55 = arith.subf %3, %9 : vector<8x8xf32>
    %56 = arith.mulf %55, %55 : vector<8x8xf32>
    %57 = arith.addf %54, %56 : vector<8x8xf32>
    %cst_28 = arith.constant 2.000000e+00 : f32
    %58 = vector.broadcast %cst_28 : f32 to vector<8x8xf32>
    %59 = arith.mulf %58, %10 : vector<8x8xf32>
    %60 = arith.mulf %59, %10 : vector<8x8xf32>
    %61 = arith.divf %57, %60 : vector<8x8xf32>
    %62 = arith.addf %53, %61 : vector<8x8xf32>
    %cst_29 = arith.constant 5.000000e-01 : f32
    %63 = vector.broadcast %cst_29 : f32 to vector<8x8xf32>
    %64 = arith.subf %62, %63 : vector<8x8xf32>
    %65 = vector.shape_cast %64 : vector<8x8xf32> to vector<1x8x8xf32>
    %cst_30 = arith.constant dense<0.000000e+00> : vector<1xf32>
    %66 = vector.multi_reduction <add>, %65, %cst_30 [1, 2] : vector<1x8x8xf32> to vector<1xf32>
    %67 = vector.shape_cast %66 : vector<1xf32> to vector<1x1x1xf32>
    %68 = vector.extract %67[0, 0, 0] : f32 from vector<1x1x1xf32>
    %69 = arith.addf %51, %68 : f32
    %70 = arith.subf %42, %69 : f32
    %71 = vector.broadcast %70 : f32 to vector<1x1xf32>
    %c0_31 = arith.constant 0 : index
    %c0_32 = arith.constant 0 : index
    %72 = vector.load %arg10[%c0_31, %c0_32] : memref<1x1xf32, #tpu.memory_space<vmem>>, vector<1x1xf32>
    tpu.vector_store %arg10[%c0_31, %c0_32], %71 {strides = array<i32>} : memref<1x1xf32, #tpu.memory_space<vmem>>, vector<1x1xf32>,
    return
  }
}

</mosaic_0001>

<bundles_post_ra>
// kernel: vbsbm_forward.1
= control target key start
LH: loop header
LB: loop body
LE: loop exit
PB: predicated region body
PF: predicated region fallthrough
CT: control target
= control target key end

     0   :  { %s1049_s0 = inlined_call_operand.vmem [shape: s8[128,128], index: 0, kind: input, shape index: {}]   ;;  %s1050_s1 = inlined_call_operand.vmem [shape: f32[8,128], index: 1, kind: input, shape index: {}]   ;;  %s1051_s2 = inlined_call_operand.vmem [shape: f32[8,8], index: 2, kind: input, shape index: {}]   ;;  %s1052_s3 = inlined_call_operand.vmem [shape: f32[8,8], index: 3, kind: input, shape index: {}]   ;;  %s1053_s4 = inlined_call_operand.vmem [shape: f32[8,8], index: 4, kind: input, shape index: {}]   ;;  %s1054_s5 = inlined_call_operand.vmem [shape: f32[128,1], index: 5, kind: input, shape index: {}]   ;;  %s1055_s6 = inlined_call_operand.vmem [shape: f32[1,128], index: 6, kind: input, shape index: {}]   ;;  %s1056_s7 = inlined_call_operand.vmem [shape: f32[8,128], index: 7, kind: input, shape index: {}]   ;;  %s1057_s8 = inlined_call_operand.vmem [shape: f32[8,8], index: 8, kind: input, shape index: {}]   ;;  %s1058_s9 = inlined_call_operand.vmem [shape: f32[8,8], index: 9, kind: input, shape index: {}]   ;;  %s1059_s10 = inlined_call_operand.hbm [shape: f32[1,1], index: 10, kind: output, shape index: {}]  }
   0x1   :  { %v72_v0 = vld [vmem:[%s1050_s1] sm:$0xff] }
   0x2   :  { %15 = vsyncpa [#allocation3], 0  ;;  %v96_v1 = vrot.slane %v72_v0, 4  ;;  %v74_v15 = vld [vmem:[%s1052_s3] sm:$0xff]  ;;  %vm131_vm4 = vcmask 64512   ;;  %v77_v36 = vld [vmem:[%s1054_s5 + $0x8] sm:$0xff] }
   0x3   :  { %v777_v17 = vmax.f32 %v74_v15, 1e-06  ;;  %v75_v18 = vld [vmem:[%s1053_s4] sm:$0xff]  ;;  %v708_v37 = vmov 0   ;;  %v78_v38 = vld [vmem:[%s1054_s5 + $0x10] sm:$0xff]  ;;  %v81_v40 = vld [vmem:[%s1054_s5 + $0x28] sm:$0xff] }
   0x4   :  { %v97_v2 = vmax.f32 %v72_v0, %v96_v1  ;;  %v786_v20 = vld [vmem:[%s1051_s2] sm:$0xff]  ;;  %635 = vset.pattern.permute.xlu1 %v708_v37  ;;  %636 = vset.pattern.permute.xlu2 %v708_v37  ;;  %v83_v42 = vld [vmem:[%s1054_s5 + $0x38] sm:$0xff]  ;;  %v85_v44 = vld [vmem:[%s1054_s5 + $0x48] sm:$0xff]  ;;  %s709_s17 = smov [#allocation2]   ;;  %s595_s4 = sshll.u32 %s1059_s10, 4  ;;  %vm586_vm13 = vcmask 0   ;;  %s596_s4 = int_to_ptr.hbm [resolvable:$true] %s595_s4 }
   0x5   :  { %v127_v19 = vmul.f32 %v777_v17, %v75_v18  ;;  %307 = vperm.xlu1 %635, %v77_v36   ;;  %v79_v45 = vld [vmem:[%s1054_s5 + $0x18] sm:$0xff]  ;;  %v80_v48 = vld [vmem:[%s1054_s5 + $0x20] sm:$0xff]  ;;  %v89_v50 = vld [vmem:[%s1054_s5 + $0x68] sm:$0xff]  ;;  %vm538_vm5 = vweird.f32 %v777_v17  ;;  %s593_s18 = sshll.u32 %s709_s17, 4  ;;  %s594_s18 = int_to_ptr.vmem [resolvable:$true] %s593_s18 }
   0x6   :  { %v98_v3 = vrot.slane %v97_v2, 2  ;;  %317 = vperm.xlu2 %636, %v79_v45   ;;  %v87_v47 = vld [vmem:[%s1054_s5 + $0x58] sm:$0xff]  ;;  %v82_v52 = vld [vmem:[%s1054_s5 + $0x30] sm:$0xff]  ;;  %v84_v55 = vld [vmem:[%s1054_s5 + $0x40] sm:$0xff] }
   0x7   :  { %v128_v24 = vadd.f32 %v127_v19, %v786_v20  ;;  %v91_v53 = vld [vmem:[%s1054_s5 + $0x78] sm:$0xff]  ;;  %v86_v57 = vld [vmem:[%s1054_s5 + $0x50] sm:$0xff]  ;;  %v76_v58 = vld [vmem:[%s1054_s5] sm:$0xff] }
   0x8   :  { %v99_v4 = vmax.f32 %v97_v2, %v98_v3  ;;  %v88_v60 = vld [vmem:[%s1054_s5 + $0x60] sm:$0xff]  ;;  %v90_v62 = vld [vmem:[%s1054_s5 + $0x70] sm:$0xff] }
   0x9   :  { %v129_v29 = vmax.f32 %v128_v24, 1e-06 }
   0xa   :  { %v100_v5 = vrot.slane %v99_v4, 1 }
   0xb   :  { %v130_v33 = vmin.f32 %v129_v29, 0.999999 }
   0xc   :  { %v101_v6 = vmax.f32 %v99_v4, %v100_v5 }
   0xd   :  { %312 = vperm.xlu1 %635, %v78_v38  }
   0xe   :  { %v768_v7 = vsub.f32 %v72_v0, %v101_v6  ;;  %322 = vperm.xlu2 %636, %v80_v48  }
  0x10   :  { %v103_v8 = vmul.f32 1.442695, %v768_v7 }
  0x12   :  { %638 = vpow2.f32 %v103_v8 }
  0x15   :  { %327 = vperm.xlu1 %635, %v81_v40  }
  0x16   :  { %332 = vperm.xlu2 %636, %v82_v52  }
  0x18   :  { %v639_v9 = vpop.eup %638 }
  0x19   :  { %v105_v10 = vrot.slane %v639_v9, 4 }
  0x1b   :  { %v106_v11 = vadd.f32 %v639_v9, %v105_v10 }
  0x1d   :  { %v107_v12 = vrot.slane %v106_v11, 2  ;;  %337 = vperm.xlu1 %635, %v83_v42  }
  0x1e   :  { %342 = vperm.xlu2 %636, %v84_v55  }
  0x1f   :  { %v108_v13 = vadd.f32 %v107_v12, %v106_v11 }
  0x21   :  { %v109_v14 = vrot.slane %v108_v13, 1 }
  0x23   :  { %v774_v16 = vadd.f32 %v109_v14, %v108_v13  ;;  %v865_v13 = vld [vmem:[%s1055_s6] ss:$0 sm:$0xff] }
  0x25   :  { %640 = vrcp.f32 %v774_v16  ;;  %v122_v23 = vand.u32 2147483648, %v774_v16  ;;  %vm116_vm0 = vweird.f32 %v774_v16  ;;  %v120_v26 = vand.u32 2147483647, %v774_v16  ;;  %347 = vperm.xlu1 %635, %v85_v44  }
  0x26   :  { %352 = vperm.xlu2 %636, %v86_v57  }
  0x27   :  { %v123_v28 = vor.u32 1.1754944e-38, %v122_v23  ;;  %vm121_vm3 = vcmp.eq.f32.partialorder %v120_v26, 8.507059e+37 }
  0x2b   :  { %v641_v21 = vpop.eup %640 }
  0x2c   :  { %v112_v22 = vmul.f32 %v641_v21, %v774_v16  ;;  %vm117_vm1 = vweird.f32 %v641_v21 }
  0x2d   :  { %vm118_vm2 = vmor %vm116_vm0, %vm117_vm1  ;;  %357 = vperm.xlu1 %635, %v87_v47  }
  0x2e   :  { %v113_v25 = vsub.f32 1.0, %v112_v22  ;;  %362 = vperm.xlu2 %636, %v88_v60  }
  0x30   :  { %v114_v27 = vmul.f32 %v641_v21, %v113_v25 }
  0x32   :  { %v115_v30 = vadd.f32 %v641_v21, %v114_v27 }
  0x34   :  { %v119_v31 = vsel %vm118_vm2, %v641_v21, %v115_v30 }
  0x35   :  { %v124_v32 = vsel %vm121_vm3, %v123_v28, %v119_v31  ;;  %367 = vperm.xlu1 %635, %v89_v50  }
  0x36   :  { %v793_v34 = vmul.f32 %v639_v9, %v124_v32  ;;  %372 = vperm.xlu2 %636, %v90_v62  }
  0x38   :  { %155 = vxpose.xlu0.b32.start.end [1/1] (short) %v793_v34, 128  ;;  %150 = vmatpush.msra.mxu0 %v793_v34 }
  0x39   :  { %604 = vmatmul.msk.f32.vlgmr.msra.gmra.mxu0 %vm131_vm4, %v130_v33 }
  0x3d   :  { %377 = vperm.xlu1 %635, %v91_v53  }
  0x60   :  { %v318_v8 = vpop.permute.xlu2 %317 }
  0x61   :  { %v386_v31 = vmul.f32 %v865_v13, %v318_v8 }
  0x68   :  { %v323_v11 = vpop.permute.xlu2 %322 }
  0x69   :  { %v387_v38 = vmul.f32 %v865_v13, %v323_v11 }
  0x6b   :  { %v403_v44 = vmax.f32 %v387_v38, 1e-06 }
  0x70   :  { %v333_v21 = vpop.permute.xlu2 %332 }
  0x77   :  { %v308_v5 = vpop.permute.xlu1 %307 }
  0x78   :  { %v384_v19 = vmul.f32 %v865_v13, %v308_v5  ;;  %v343_v33 = vpop.permute.xlu2 %342 }
  0x7a   :  { %v400_v24 = vmax.f32 %v384_v19, 1e-06 }
  0x7f   :  { %v313_v9 = vpop.permute.xlu1 %312 }
  0x80   :  { %v385_v25 = vmul.f32 %v865_v13, %v313_v9 }
  0x82   :  { %v401_v30 = vmax.f32 %v385_v25, 1e-06 }
  0x87   :  { %v328_v14 = vpop.permute.xlu1 %327 }
  0x8f   :  { %v338_v28 = vpop.permute.xlu1 %337 }
  0x90   :  { %v390_v62 = vmul.f32 %v865_v13, %v338_v28 }
  0x9f   :  { %634 = vset.pattern.permute.xlu0 %v708_v37  ;;  %v402_v37 = vmax.f32 %v386_v31, 1e-06 }
  0xb6   :  { %v152_v35 = vpop.f32.mrf.mxu0 }
  0xb7   :  { %250 = vmatpush.msrb.mxu0 %v152_v35  ;;  %622 = vmatpush.msra.mxu1 %v152_v35 }
  0xb8   :  { %623 = vmatpush.msra.mxu2 %v152_v35  ;;  %624 = vmatpush.msra.mxu3 %v152_v35 }
  0xdc   :  { %v171_v39 = vpop.trf.xlu0 }
  0xdd   :  { %605 = vmatmul.msk.f32.vlgmr.msrb.gmra.mxu0 %vm131_vm4, %v171_v39  ;;  %v36_v39 = vld [vmem:[%s1049_s0] sm:$0xff] }
  0xde   :  { %v40_v40 = vunpack.c.0.s8 %v36_v39  ;;  %v41_v45 = vunpack.c.1.s8 %v36_v39  ;;  %v42_v57 = vunpack.c.2.s8 %v36_v39 }
  0xe0   :  { %v56_v50 = vcvt.s32.f32 %v40_v40  ;;  %v57_v55 = vcvt.s32.f32 %v41_v45 }
  0xe4   :  { %v172_v41 = vpop.trf.xlu0 }
  0xe5   :  { %606 = vmatmul.msk.f32.vlgmr.msra.gmra.mxu1 %vm131_vm4, %v172_v41 }
  0xec   :  { %v173_v43 = vpop.trf.xlu0 }
  0xed   :  { %607 = vmatmul.msk.f32.gmra.mxu1 %vm131_vm4, %v173_v43  ;;  %v388_v43 = vmul.f32 %v865_v13, %v328_v14 }
  0xef   :  { %v404_v52 = vmax.f32 %v388_v43, 1e-06 }
  0xf4   :  { %v174_v46 = vpop.trf.xlu0 }
  0xf5   :  { %608 = vmatmul.msk.f32.gmra.mxu1 %vm131_vm4, %v174_v46  ;;  %v348_v46 = vpop.permute.xlu1 %347 }
  0xf6   :  { %v392_v31 = vmul.f32 %v865_v13, %v348_v46 }
  0xfc   :  { %v175_v49 = vpop.trf.xlu0 }
  0xfd   :  { %609 = vmatmul.msk.f32.gmra.mxu1 %vm131_vm4, %v175_v49  ;;  %v389_v49 = vmul.f32 %v865_v13, %v333_v21  ;;  %v358_v8 = vpop.permute.xlu1 %357 }
  0xff   :  { %v405_v60 = vmax.f32 %v389_v49, 1e-06 }
 0x104   :  { %v176_v51 = vpop.trf.xlu0 }
 0x105   :  { %610 = vmatmul.msk.f32.gmra.mxu1 %vm131_vm4, %v176_v51 }
 0x10c   :  { %v177_v54 = vpop.trf.xlu0 }
 0x10d   :  { %611 = vmatmul.msk.f32.vlgmr.msra.gmra.mxu2 %vm131_vm4, %v177_v54  ;;  %v353_v54 = vpop.permute.xlu2 %352 }
 0x10e   :  { %v393_v45 = vmul.f32 %v865_v13, %v353_v54  ;;  %v368_v54 = vpop.permute.xlu1 %367 }
 0x114   :  { %v178_v56 = vpop.trf.xlu0 }
 0x115   :  { %612 = vmatmul.msk.f32.gmra.mxu2 %vm131_vm4, %v178_v56  ;;  %v363_v25 = vpop.permute.xlu2 %362 }
 0x11c   :  { %v179_v59 = vpop.trf.xlu0 }
 0x11d   :  { %613 = vmatmul.msk.f32.gmra.mxu2 %vm131_vm4, %v179_v59 }
 0x11e   :  { %302 = vperm.xlu0 %634, %v76_v58  }
 0x124   :  { %v180_v61 = vpop.trf.xlu0 }
 0x125   :  { %614 = vmatmul.msk.f32.gmra.mxu2 %vm131_vm4, %v180_v61 }
 0x12c   :  { %v181_v63 = vpop.trf.xlu0 }
 0x12d   :  { %615 = vmatmul.msk.f32.gmra.mxu2 %vm131_vm4, %v181_v63 }
 0x134   :  { %v182_v0 = vpop.trf.xlu0 }
 0x135   :  { %616 = vmatmul.msk.f32.vlgmr.msra.gmra.mxu3 %vm131_vm4, %v182_v0 }
 0x13c   :  { %v183_v1 = vpop.trf.xlu0 }
 0x13d   :  { %617 = vmatmul.msk.f32.gmra.mxu3 %vm131_vm4, %v183_v1  ;;  %v58_v1 = vcvt.s32.f32 %v42_v57 }
 0x144   :  { %v184_v2 = vpop.trf.xlu0 }
 0x145   :  { %618 = vmatmul.msk.f32.gmra.mxu3 %vm131_vm4, %v184_v2 }
 0x14c   :  { %v185_v3 = vpop.trf.xlu0 }
 0x14d   :  { %619 = vmatmul.msk.f32.gmra.mxu3 %vm131_vm4, %v185_v3  ;;  %v43_v3 = vunpack.c.3.s8 %v36_v39 }
 0x154   :  { %v186_v4 = vpop.trf.xlu0 }
 0x155   :  { %620 = vmatmul.msk.f32.gmra.mxu3 %vm131_vm4, %v186_v4  ;;  %v900_v4 = vld [vmem:[%s1049_s0 + $0x8] sm:$0xff] }
 0x156   :  { %v44_v11 = vunpack.c.0.s8 %v900_v4  ;;  %v47_v57 = vunpack.c.3.s8 %v900_v4 }
 0x15a   :  { %v252_v26 = vpop.f32.mrf.mxu0 }
 0x162   :  { %v255_v6 = vpop.f32.mrf.mxu1 }
 0x163   :  { %v872_v29 = vmul.f32 %v400_v24, %v255_v6  ;;  %v391_v6 = vmul.f32 %v865_v13, %v343_v33 }
 0x16a   :  { %v258_v10 = vpop.f32.mrf.mxu1 }
 0x16b   :  { %v879_v36 = vmul.f32 %v401_v30, %v258_v10  ;;  %v60_v30 = vcvt.s32.f32 %v44_v11 }
 0x172   :  { %v261_v22 = vpop.f32.mrf.mxu1 }
 0x173   :  { %v886_v42 = vmul.f32 %v402_v37, %v261_v22  ;;  %v59_v22 = vcvt.s32.f32 %v43_v3 }
 0x17a   :  { %v264_v35 = vpop.f32.mrf.mxu1 }
 0x17b   :  { %v891_v53 = vmul.f32 %v403_v44, %v264_v35 }
 0x182   :  { %v267_v58 = vpop.f32.mrf.mxu1 }
 0x183   :  { %v895_v63 = vmul.f32 %v404_v52, %v267_v58 }
 0x190   :  { %v303_v12 = vpop.permute.xlu0 %302  ;;  %v270_v18 = vpop.f32.mrf.mxu2 }
 0x191   :  { %v383_v15 = vmul.f32 %v865_v13, %v303_v12  ;;  %v904_v10 = vmul.f32 %v405_v60, %v270_v18  ;;  %v406_v12 = vmax.f32 %v390_v62, 1e-06  ;;  %v915_v18 = vld [vmem:[%s1058_s9] sm:$0xff]  ;;  %v409_v62 = vmax.f32 %v393_v45, 1e-06 }
 0x192   :  { %v554_v33 = vmul.f32 2.0, %v915_v18 }
 0x193   :  { %v399_v23 = vmax.f32 %v383_v15, 1e-06 }
 0x194   :  { %v936_v49 = vmul.f32 %v554_v33, %v915_v18 }
 0x195   :  { %v870_v27 = vmul.f32 %v399_v23, %v252_v26  ;;  %v45_v26 = vunpack.c.1.s8 %v900_v4 }
 0x196   :  { %vm561_vm9 = vweird.f32 %v936_v49 }
 0x197   :  { %642 = vlog2.f32 %v870_v27  ;;  %v61_v43 = vcvt.s32.f32 %v45_v26 }
 0x198   :  { %v875_v32 = vpop.f32.mrf.mxu2  ;;  %644 = vlog2.f32 %v872_v29 }
 0x199   :  { %646 = vlog2.f32 %v879_v36 }
 0x19a   :  { %648 = vlog2.f32 %v886_v42 }
 0x19b   :  { %650 = vlog2.f32 %v891_v53 }
 0x19c   :  { %652 = vrcp.f32 %v777_v17 }
 0x19d   :  { %v643_v41 = vpop.eup %642  ;;  %654 = vlog2.f32 %v895_v63 }
 0x19e   :  { %v645_v47 = vpop.eup %644  ;;  %v432_v51 = vmul.f32 0.6931472, %v643_v41  ;;  %656 = vlog2.f32 %v904_v10  ;;  %v46_v41 = vunpack.c.2.s8 %v900_v4 }
 0x19f   :  { %v434_v56 = vmul.f32 0.6931472, %v645_v47  ;;  %v647_v59 = vpop.eup %646  ;;  %658 = vlog2.f32 %v774_v16 }
 0x1a0   :  { %v276_v48 = vpop.f32.mrf.mxu2  ;;  %v463_v61 = vmul.f32 %v432_v51, %v56_v50  ;;  %v436_v2 = vmul.f32 0.6931472, %v647_v59  ;;  %v649_v5 = vpop.eup %648 }
 0x1a1   :  { %v464_v0 = vmul.f32 %v434_v56, %v57_v55  ;;  %v438_v23 = vmul.f32 0.6931472, %v649_v5  ;;  %v651_v24 = vpop.eup %650  ;;  %v394_v55 = vmul.f32 %v865_v13, %v358_v8  ;;  %v396_v56 = vmul.f32 %v865_v13, %v368_v54  ;;  %v951_v8 = vld [vmem:[%s1049_s0 + $0x10] sm:$0xff] }
 0x1a2   :  { %v479_v9 = vsub.f32 %v463_v61, %v870_v27  ;;  %v465_v21 = vmul.f32 %v436_v2, %v58_v1  ;;  %v407_v27 = vmax.f32 %v391_v6, 1e-06  ;;  %v924_v35 = vpop.eup %652  ;;  %v440_v39 = vmul.f32 0.6931472, %v651_v24  ;;  %v373_v1 = vpop.permute.xlu2 %372  ;;  %v93_v24 = vld [vmem:[%s1056_s7] sm:$0xff] }
 0x1a3   :  { %v480_v19 = vsub.f32 %v464_v0, %v872_v29  ;;  %v921_v29 = vmul.f32 %v406_v12, %v875_v32  ;;  %v466_v38 = vmul.f32 %v438_v23, %v59_v22  ;;  %v655_v40 = vpop.eup %654  ;;  %v408_v32 = vmax.f32 %v392_v31, 1e-06 }
 0x1a4   :  { %v481_v37 = vsub.f32 %v465_v21, %v879_v36  ;;  %v930_v46 = vmul.f32 %v407_v27, %v276_v48  ;;  %v534_v36 = vmul.f32 %v924_v35, %v777_v17  ;;  %v657_v16 = vpop.eup %656  ;;  %v467_v51 = vmul.f32 %v440_v39, %v60_v30 }
 0x1a5   :  { %v495_v28 = vadd.f32 %v480_v19, %v479_v9  ;;  %660 = vlog2.f32 %v921_v29  ;;  %v482_v50 = vsub.f32 %v466_v38, %v886_v42  ;;  %v442_v52 = vmul.f32 0.6931472, %v655_v40  ;;  %v659_v60 = vpop.eup %658 }
 0x1a6   :  { %v62_v48 = vcvt.s32.f32 %v46_v41  ;;  %v395_v0 = vmul.f32 %v865_v13, %v363_v25  ;;  %662 = vlog2.f32 %v930_v46  ;;  %v444_v42 = vmul.f32 0.6931472, %v657_v16 }
 0x1a7   :  { %v496_v44 = vadd.f32 %v495_v28, %v481_v37  ;;  %v520_v2 = vmul.f32 0.6931472, %v659_v60  ;;  %v535_v3 = vsub.f32 1.0, %v534_v36  ;;  %664 = vrcp.f32 %v936_v49  ;;  %v378_v36 = vpop.permute.xlu1 %377 }
 0x1a8   :  { %v279_v14 = vpop.f32.mrf.mxu2  ;;  %v483_v5 = vsub.f32 %v467_v51, %v891_v53  ;;  %v468_v6 = vmul.f32 %v442_v52, %v61_v43  ;;  %v410_v4 = vmax.f32 %v394_v55, 1e-06  ;;  %v412_v12 = vmax.f32 %v396_v56, 1e-06 }
 0x1a9   :  { %v942_v58 = vmul.f32 %v408_v32, %v279_v14  ;;  %v497_v61 = vadd.f32 %v496_v44, %v482_v50  ;;  %v63_v14 = vcvt.s32.f32 %v47_v57  ;;  %v521_v19 = vsub.f32 %v768_v7, %v520_v2  ;;  %v998_v57 = vld [vmem:[%s1049_s0 + $0x18] sm:$0xff] }
 0x1aa   :  { %v411_v22 = vmax.f32 %v395_v0, 1e-06  ;;  %v397_v53 = vmul.f32 %v865_v13, %v373_v1  ;;  %v469_v25 = vmul.f32 %v444_v42, %v62_v48  ;;  %v48_v26 = vunpack.c.0.s8 %v951_v8  ;;  %v94_v1 = vld [vmem:[%s1057_s8] sm:$0xff] }
 0x1ab   :  { %v661_v11 = vpop.eup %660  ;;  %666 = vlog2.f32 %v942_v58  ;;  %v498_v21 = vadd.f32 %v497_v61, %v483_v5  ;;  %v522_v28 = vsub.f32 %v521_v19, %v93_v24  ;;  %v536_v30 = vmul.f32 %v924_v35, %v535_v3 }
 0x1ac   :  { %v663_v31 = vpop.eup %662  ;;  %v484_v7 = vsub.f32 %v468_v6, %v895_v63  ;;  %v446_v33 = vmul.f32 0.6931472, %v661_v11  ;;  %v49_v38 = vunpack.c.1.s8 %v951_v8  ;;  %vm539_vm6 = vweird.f32 %v924_v35 }
 0x1ad   :  { %v523_v39 = vmul.f32 %v522_v28, %v793_v34  ;;  %v544_v63 = vand.u32 2147483648, %v777_v17  ;;  %v485_v44 = vsub.f32 %v469_v25, %v904_v10  ;;  %v64_v45 = vcvt.s32.f32 %v48_v26  ;;  %vm988_vm7 = vmor %vm538_vm5, %vm539_vm6 }
 0x1ae   :  { %v499_v40 = vadd.f32 %v498_v21, %v484_v7  ;;  %v537_v32 = vadd.f32 %v924_v35, %v536_v30  ;;  %v542_v34 = vand.u32 2147483647, %v777_v17  ;;  %v448_v16 = vmul.f32 0.6931472, %v663_v31 }
 0x1af   :  { %524 = vadd.xlane.f32.xlu1 %v523_v39  ;;  %v413_v51 = vmax.f32 %v397_v53, 1e-06  ;;  %v65_v52 = vcvt.s32.f32 %v49_v38  ;;  %v50_v55 = vunpack.c.2.s8 %v951_v8  ;;  %v398_v60 = vmul.f32 %v865_v13, %v378_v36 }
 0x1b0   :  { %v282_v59 = vpop.f32.mrf.mxu2  ;;  %v500_v48 = vadd.f32 %v499_v40, %v485_v44  ;;  %v51_v61 = vunpack.c.3.s8 %v951_v8  ;;  %v541_v0 = vsel %vm988_vm7, %v924_v35, %v537_v32  ;;  %vm543_vm8 = vcmp.eq.f32.partialorder %v542_v34, 8.507059e+37 }
 0x1b1   :  { %v953_v9 = vmul.f32 %v409_v62, %v282_v59  ;;  %v545_v59 = vor.u32 1.1754944e-38, %v544_v63  ;;  %v471_v3 = vmul.f32 %v448_v16, %v64_v45  ;;  %v66_v13 = vcvt.s32.f32 %v50_v55 }
 0x1b2   :  { %v52_v8 = vunpack.c.0.s8 %v998_v57  ;;  %v551_v19 = vsub.f32 %v786_v20, %v94_v1  ;;  %v67_v21 = vcvt.s32.f32 %v51_v61  ;;  %v414_v24 = vmax.f32 %v398_v60, 1e-06 }
 0x1b3   :  { %668 = vlog2.f32 %v953_v9  ;;  %v546_v35 = vsel %vm543_vm8, %v545_v59, %v541_v0  ;;  %v487_v25 = vsub.f32 %v471_v3, %v930_v46  ;;  %v54_v26 = vunpack.c.2.s8 %v998_v57 }
 0x1b4   :  { %v68_v30 = vcvt.s32.f32 %v52_v8  ;;  %v547_v7 = vmul.f32 %v546_v35, %v915_v18  ;;  %v567_v63 = vand.u32 2147483648, %v936_v49  ;;  %v565_v18 = vand.u32 2147483647, %v936_v49 }
 0x1b5   :  { %v70_v44 = vcvt.s32.f32 %v54_v26  ;;  %v552_v16 = vmul.f32 %v551_v19, %v551_v19 }
 0x1b6   :  { %v568_v55 = vor.u32 1.1754944e-38, %v567_v63  ;;  %vm566_vm12 = vcmp.eq.f32.partialorder %v565_v18, 8.507059e+37 }
 0x1b8   :  { %v909_v15 = vpop.f32.mrf.mxu3 }
 0x1b9   :  { %v959_v23 = vmul.f32 %v410_v4, %v909_v15  ;;  %v970_v15 = vpop.eup %664 }
 0x1ba   :  { %v667_v43 = vpop.eup %666  ;;  %v557_v10 = vmul.f32 %v970_v15, %v936_v49  ;;  %vm562_vm10 = vweird.f32 %v970_v15 }
 0x1bb   :  { %670 = vlog2.f32 %v959_v23  ;;  %v669_v54 = vpop.eup %668  ;;  %v450_v56 = vmul.f32 0.6931472, %v667_v43  ;;  %vm1031_vm11 = vmor %vm561_vm9, %vm562_vm10 }
 0x1bc   :  { %v558_v6 = vsub.f32 1.0, %v557_v10  ;;  %v452_v4 = vmul.f32 0.6931472, %v669_v54  ;;  %v550_v10 = vmul.f32 %v777_v17, %v777_v17 }
 0x1be   :  { %v473_v28 = vmul.f32 %v452_v4, %v66_v13  ;;  %v553_v59 = vadd.f32 %v552_v16, %v550_v10 }
 0x1c0   :  { %v288_v47 = vpop.f32.mrf.mxu3  ;;  %v489_v34 = vsub.f32 %v473_v28, %v953_v9 }
 0x1c1   :  { %v968_v37 = vmul.f32 %v411_v22, %v288_v47  ;;  %v470_v47 = vmul.f32 %v446_v33, %v63_v14  ;;  %v671_v42 = vpop.eup %670  ;;  %v472_v14 = vmul.f32 %v450_v56, %v65_v52  ;;  %v55_v52 = vunpack.c.3.s8 %v998_v57 }
 0x1c2   :  { %v454_v22 = vmul.f32 0.6931472, %v671_v42 }
 0x1c3   :  { %672 = vlog2.f32 %v968_v37  ;;  %v486_v2 = vsub.f32 %v470_v47, %v921_v29  ;;  %v53_v29 = vunpack.c.1.s8 %v998_v57  ;;  %v488_v20 = vsub.f32 %v472_v14, %v942_v58 }
 0x1c4   :  { %v474_v38 = vmul.f32 %v454_v22, %v67_v21 }
 0x1c5   :  { %v69_v39 = vcvt.s32.f32 %v53_v29 }
 0x1c8   :  { %v291_v27 = vpop.f32.mrf.mxu3 }
 0x1c9   :  { %v977_v41 = vmul.f32 %v412_v12, %v291_v27  ;;  %v673_v11 = vpop.eup %672  ;;  %v501_v12 = vadd.f32 %v500_v48, %v486_v2  ;;  %v559_v27 = vmul.f32 %v970_v15, %v558_v6 }
 0x1ca   :  { %v456_v31 = vmul.f32 0.6931472, %v673_v11 }
 0x1cb   :  { %674 = vlog2.f32 %v977_v41  ;;  %v502_v33 = vadd.f32 %v501_v12, %v487_v25  ;;  %v560_v32 = vadd.f32 %v970_v15, %v559_v27 }
 0x1cc   :  { %v475_v58 = vmul.f32 %v456_v31, %v68_v30 }
 0x1cd   :  { %v503_v50 = vadd.f32 %v502_v33, %v488_v20  ;;  %v564_v49 = vsel %vm1031_vm11, %v970_v15, %v560_v32 }
 0x1ce   :  { %v491_v48 = vsub.f32 %v475_v58, %v968_v37 }
 0x1cf   :  { %v504_v54 = vadd.f32 %v503_v50, %v489_v34 }
 0x1d0   :  { %v294_v62 = vpop.f32.mrf.mxu3 }
 0x1d1   :  { %v1010_v5 = vmul.f32 %v413_v51, %v294_v62  ;;  %v675_v53 = vpop.eup %674  ;;  %v490_v51 = vsub.f32 %v474_v38, %v959_v23  ;;  %v71_v62 = vcvt.s32.f32 %v55_v52  ;;  %v569_v23 = vsel %vm566_vm12, %v568_v55, %v564_v49 }
 0x1d2   :  { %v458_v40 = vmul.f32 0.6931472, %v675_v53  ;;  %v570_v3 = vmul.f32 %v569_v23, %v553_v59 }
 0x1d3   :  { %676 = vlog2.f32 %v1010_v5  ;;  %v505_v61 = vadd.f32 %v504_v54, %v490_v51 }
 0x1d4   :  { %678 = vlog2.f32 %v547_v7  ;;  %v476_v9 = vmul.f32 %v458_v40, %v69_v39 }
 0x1d5   :  { %v506_v42 = vadd.f32 %v505_v61, %v491_v48 }
 0x1d6   :  { %v492_v17 = vsub.f32 %v476_v9, %v977_v41 }
 0x1d8   :  { %v297_v46 = vpop.f32.mrf.mxu3  ;;  %v507_v15 = vadd.f32 %v506_v42, %v492_v17 }
 0x1d9   :  { %v677_v43 = vpop.eup %676  ;;  %v430_v45 = vmul.f32 %v414_v24, %v297_v46 }
 0x1da   :  { %v460_v47 = vmul.f32 0.6931472, %v677_v43  ;;  %v679_v60 = vpop.eup %678 }
 0x1db   :  { %680 = vlog2.f32 %v430_v45  ;;  %v549_v2 = vmul.f32 0.6931472, %v679_v60 }
 0x1dc   :  { %v477_v56 = vmul.f32 %v460_v47, %v70_v44 }
 0x1dd   :  { %v571_v37 = vadd.f32 %v570_v3, %v549_v2 }
 0x1de   :  { %v493_v57 = vsub.f32 %v477_v56, %v1010_v5 }
 0x1df   :  { %v621_v11 = vadd.f32 -0.5, %v571_v37 }
 0x1e0   :  { %v508_v4 = vadd.f32 %v507_v15, %v493_v57 }
 0x1e1   :  { %v681_v0 = vpop.eup %680  ;;  %v573_v12 = vsel %vm131_vm4, %v621_v11, 0.0 }
 0x1e2   :  { %v462_v1 = vmul.f32 0.6931472, %v681_v0 }
 0x1e4   :  { %v478_v6 = vmul.f32 %v462_v1, %v71_v62 }
 0x1e6   :  { %v494_v13 = vsub.f32 %v478_v6, %v430_v45 }
 0x1e8   :  { %v509_v8 = vadd.f32 %v508_v4, %v494_v13 }
 0x1ea   :  { %510 = vadd.xlane.f32.xlu2 %v509_v8 }
 0x1f2   :  { %574 = vadd.xlane.f32.xlu2 %v573_v12 }
 0x222   :  { %v525_v41 = vpop.xlane.xlu1 %524 }
 0x223   :  { %v526_v14 = vrot.slane %v525_v41, 4 }
 0x225   :  { %v527_v35 = vadd.f32 %v526_v14, %v525_v41 }
 0x227   :  { %v528_v19 = vrot.slane %v527_v35, 2 }
 0x229   :  { %v529_v22 = vadd.f32 %v528_v19, %v527_v35 }
 0x22b   :  { %v530_v24 = vrot.slane %v529_v22, 1 }
 0x22d   :  { %v531_v30 = vadd.f32 %v530_v24, %v529_v22 }
 0x25d   :  { %v511_v21 = vpop.xlane.xlu2 %510 }
 0x25e   :  { %v512_v5 = vrot.slane %v511_v21, 4 }
 0x260   :  { %v513_v29 = vadd.f32 %v512_v5, %v511_v21 }
 0x262   :  { %v514_v53 = vrot.slane %v513_v29, 2 }
 0x264   :  { %v515_v25 = vadd.f32 %v514_v53, %v513_v29 }
 0x265   :  { %v575_v26 = vpop.xlane.xlu2 %574 }
 0x266   :  { %v576_v27 = vrot.slane %v575_v26, 4  ;;  %v516_v28 = vrot.slane %v515_v25, 1 }
 0x268   :  { %v577_v31 = vadd.f32 %v576_v27, %v575_v26  ;;  %v517_v7 = vadd.f32 %v516_v28, %v515_v25 }
 0x26a   :  { %v578_v33 = vrot.slane %v577_v31, 2  ;;  %625 = vpush %v517_v7 }
 0x26b   :  { %627 = vpush %v531_v30 }
 0x26c   :  { %v579_v20 = vadd.f32 %v578_v33, %v577_v31 }
 0x26e   :  { %v580_v38 = vrot.slane %v579_v20, 1 }
 0x270   :  { %v581_v39 = vadd.f32 %v580_v38, %v579_v20 }
 0x272   :  { %629 = vpush %v581_v39 }
 0x29b   :  { %s626_s0 = spop %625 }
 0x29c   :  { %s628_s8 = spop %627 }
 0x2a3   :  { %s630_s16 = spop %629 }
 0x2a4   :  { %s583_s19 = sadd.f32 %s630_s16, %s628_s8 }
 0x2a6   :  { %s584_s20 = ssub.f32 %s626_s0, %s583_s19 }
 0x2a8   :  { %v585_v40 = vstv %s584_s20 }
 0x2a9   :  { %587 = vst.msk [vmem:[#allocation2] sm:$0x1] %vm586_vm13, %v585_v40 }
 0x2aa   :  { %598 = dma.vmem_to_hbm [thread:$0]  %s594_s18, 16, %s596_s4, [#allocation3]  }
 0x2ab   :  { %706 = dma.done.wait [#allocation3], 16  }
 0x2ac   :  { %707 = vsyncadd [#allocation3], 4294967280 }
 0x2ad   :  { %603 = vsyncpa [#allocation3], 1 }

</bundles_post_ra>
